<compile_context>
chip_gen: v7x
topology: tpu7x:2x2x1
jax: 0.10.0
libtpu: 0.0.40
codegen_flags: <defaults>
</compile_context>

<pallas_src>
import functools

import jax
import jax.numpy as jnp
from jax.experimental import pallas as pl
from jax.experimental.pallas import tpu as pltpu


COMPUTE_DTYPE = jnp.bfloat16   # A / W / support in bf16; f32 accumulation kept.


def _round_up(x, m):
    return (x + m - 1) // m * m


def _phys_vmem_bytes():
    try:
        return int(pltpu.get_tpu_info().vmem_capacity_bytes)
    except Exception:
        return 64 * 1024 * 1024        # conservative fallback (v7x per-TC VMEM)


def _pick_tiling(n, dpad, itemsize, out_itemsize, budget_bytes, force_tile_m=None):
    """Choose (tile_m, npad, a_buffer_count) against a VMEM budget."""
    def vmem_cost(tm, npad, nbuf):
        return ((2 * npad * dpad                  # double support scratch
                 + nbuf * tm * npad               # A pipeline buffers
                 + 4 * dpad * dpad) * itemsize    # W0 + W_next (double-buffered)
                + 2 * tm * dpad * out_itemsize    # output buffers
                + 2 * dpad * 4)                   # bias

    if force_tile_m is not None:
        tm = force_tile_m
        npad = _round_up(n, tm)
        return tm, npad, (3 if npad // tm >= 3 else 2)

    # Small-N fast path: one row tile -> A is DMA'd once and stays resident.
    tm = _round_up(n, 128)
    if vmem_cost(tm, tm, 2) <= budget_bytes:
        return tm, tm, 2

    for tm in (512, 256, 128):
        npad = _round_up(n, tm)
        nbuf = 3 if npad // tm >= 3 else 2
        if vmem_cost(tm, npad, nbuf) <= budget_bytes:
            return tm, npad, nbuf

    tm = 128
    npad = _round_up(n, tm)
    return tm, npad, 2


# ----------------------------------------------------------------------------
# Fused multi-layer GCN kernel.
#   grid = (num_layers, num_row_tiles), both sequential ("arbitrary").
#   (0, 0)      : DMA X (HBM) -> sup_scr[1]; sup_scr[0] = X @ W[0]   (once, total)
#   (l, i)      : h = A[rows i] @ sup_scr[l%2] + b[l]; ReLU (non-final layers)
#                 h_all[l, rows i] = h                               (lane-dense)
#                 sup_scr[1-l%2][rows i] = h @ W[l+1]                (non-final)
# ----------------------------------------------------------------------------
def _fused_gcn_kernel(x_hbm, a_ref, w0_ref, wn_ref, b_ref, h_ref, sup_scr,
                      *, tile_m):
    layer = pl.program_id(0)
    tile = pl.program_id(1)
    n_layers = pl.num_programs(0)
    cur = layer % 2
    nxt = 1 - cur

    # One-time prologue: pull X from HBM into the spare support slot and build
    # the layer-0 support.  X never occupies a pipelined resident buffer.
    @pl.when(jnp.logical_and(layer == 0, tile == 0))
    def _():
        pltpu.sync_copy(x_hbm, sup_scr.at[1])
        sup_scr[0] = jnp.dot(
            sup_scr[1], w0_ref[...],
            preferred_element_type=jnp.float32).astype(sup_scr.dtype)

    # Steady state: stream one adjacency row tile through the MXU.
    h = jnp.dot(a_ref[...], sup_scr[cur], preferred_element_type=jnp.float32)
    h = h + b_ref[0]                                         # (1, Dpad) broadcast
    h = jnp.where(layer + 1 < n_layers, jnp.maximum(h, 0.0), h)   # ReLU except last
    h_ref[0] = h.astype(h_ref.dtype)                         # lane-dense store

    # Incrementally build the next layer's support rows (replaces feat_scr and
    # the per-layer monolithic feat @ W bubble).
    @pl.when(layer + 1 < n_layers)
    def _():
        row0 = pl.multiple_of(tile * tile_m, tile_m)
        sup_scr[nxt, pl.ds(row0, tile_m), :] = jnp.dot(
            h.astype(sup_scr.dtype), wn_ref[0],
            preferred_element_type=jnp.float32).astype(sup_scr.dtype)


def fused_gcn_layers(features, adj, weights, biases, *,
                     compute_dtype=COMPUTE_DTYPE, force_tile_m=None):
    """Run all GraphConvolution layers in one fused pallas_call.

    Returns (stacked padded hidden states (L, Npad, Dpad) in compute dtype,
             list of true per-layer output dims).
    """
    n, f_in = features.shape
    num_layers = len(weights)
    out_dims = [int(w.shape[1]) for w in weights]

    cdt = jnp.dtype(compute_dtype)
    out_dtype = cdt                               # bf16 hidden-state writeback
    dpad = _round_up(max([f_in] + out_dims), 128)

    phys_vmem = _phys_vmem_bytes()
    tile_budget = min(int(phys_vmem * 0.6), 96 * 1024 * 1024)
    tm, npad, a_bufs = _pick_tiling(n, dpad, cdt.itemsize, out_dtype.itemsize,
                                    tile_budget, force_tile_m)
    num_tiles = npad // tm

    # Zero-pad everything (zeros are exact no-ops through matmul/bias/relu;
    # padded A rows/cols are zero so padded nodes never contaminate real ones).
    x_p = jnp.zeros((npad, dpad), cdt).at[:n, :f_in].set(features.astype(cdt))
    a_p = jnp.zeros((npad, npad), cdt).at[:n, :n].set(adj.astype(cdt))
    w0 = jnp.zeros((dpad, dpad), cdt).at[
        : weights[0].shape[0], : weights[0].shape[1]].set(weights[0].astype(cdt))
    wn_stack = jnp.zeros((num_layers, dpad, dpad), cdt)     # wn_stack[l] = W[l+1]
    for l in range(num_layers - 1):
        w = weights[l + 1]
        wn_stack = wn_stack.at[l, : w.shape[0], : w.shape[1]].set(w.astype(cdt))
    b_stack = jnp.zeros((num_layers, 1, dpad), jnp.float32)
    for l, b in enumerate(biases):
        b_stack = b_stack.at[l, 0, : b.shape[0]].set(b.astype(jnp.float32))

    # VMEM budget derived from the actual buffers (not a hardcoded constant).
    vmem_needed = ((2 * npad * dpad + a_bufs * tm * npad + 4 * dpad * dpad)
                   * cdt.itemsize
                   + 2 * tm * dpad * out_dtype.itemsize
                   + 2 * dpad * 4)
    vmem_limit = int(min(max(int(vmem_needed * 1.5) + (4 << 20), 32 << 20),
                         phys_vmem - (8 << 20)))

    # Advisory cost hint for the XLA scheduler around the kernel.
    flops = (2 * npad * dpad * dpad                             # X @ W0 (once)
             + num_layers * 2 * npad * npad * dpad              # A @ support
             + max(num_layers - 1, 0) * 2 * npad * dpad * dpad)  # h @ W[l+1]
    a_streams = 1 if num_tiles == 1 else num_layers
    bytes_accessed = (a_streams * npad * npad * cdt.itemsize
                      + npad * dpad * cdt.itemsize
                      + (num_layers + 1) * dpad * dpad * cdt.itemsize
                      + num_layers * dpad * 4
                      + num_layers * npad * dpad * out_dtype.itemsize)
    cost = pl.CostEstimate(flops=int(flops), transcendentals=0,
                           bytes_accessed=int(bytes_accessed))

    def _a_spec():
        if a_bufs > 2:
            try:
                return pl.BlockSpec((tm, npad), lambda l, i: (i, 0),
                                    pipeline_mode=pl.Buffered(a_bufs))
            except TypeError:     # older API without pipeline_mode: fall back
                pass
        return pl.BlockSpec((tm, npad), lambda l, i: (i, 0))

    kernel = functools.partial(_fused_gcn_kernel, tile_m=tm)
    h_all = pl.pallas_call(
        kernel,
        out_shape=jax.ShapeDtypeStruct((num_layers, npad, dpad), out_dtype),
        grid=(num_layers, num_tiles),
        in_specs=[
            pl.BlockSpec(memory_space=pl.ANY),                      # X: raw HBM
            _a_spec(),                                              # A row tile
            pl.BlockSpec((dpad, dpad), lambda l, i: (0, 0)),        # W[0]
            pl.BlockSpec((1, dpad, dpad), lambda l, i: (l, 0, 0)),  # W[l+1]
            pl.BlockSpec((1, 1, dpad), lambda l, i: (l, 0, 0)),     # b[l]
        ],
        out_specs=pl.BlockSpec((1, tm, dpad), lambda l, i: (l, i, 0)),
        scratch_shapes=[
            pltpu.VMEM((2, npad, dpad), cdt),    # {current, next} layer support
        ],
        compiler_params=pltpu.CompilerParams(
            # Both axes carry the on-chip support scratch -> sequential.
            dimension_semantics=("arbitrary", "arbitrary"),
            vmem_limit_bytes=vmem_limit,
        ),
        cost_estimate=cost,
    )(x_p, a_p, w0, wn_stack, b_stack)

    return h_all, out_dims


# ----------------------------------------------------------------------------
# Full Custom_GCN forward (glue in plain JAX; all layer compute in Pallas).
# ----------------------------------------------------------------------------
def custom_gcn_forward(features, adj, weights, biases, mask=None, labels=None,
                       flag="Train"):
    n = features.shape[0]
    num_layers = len(weights)

    # TODO(synk): input_dropout / dropout are identity here (deterministic /
    # eval-mode semantics); stateful torch dropout has no direct analogue.
    h_all, out_dims = fused_gcn_layers(features, adj, weights, biases)

    all_hidden_states = (features,)
    for l in range(num_layers):
        all_hidden_states = all_hidden_states + (
            h_all[l, :n, : out_dims[l]].astype(jnp.float32),)

    logits = all_hidden_states[-1]                      # (N, num_labels), f32
    preds = jnp.argmax(logits, axis=-1)
    outputs = (preds, all_hidden_states)

    if flag.upper() == "TRAIN":
        num_labels = logits.shape[-1]
        logits_flat = logits.reshape(-1, num_labels)
        labels_flat = labels.reshape(-1)
        valid = labels_flat != -1
        safe_labels = jnp.where(valid, labels_flat, 0)
        logz = jax.nn.logsumexp(logits_flat, axis=-1)
        picked = jnp.take_along_axis(logits_flat, safe_labels[:, None], axis=-1)[:, 0]
        per_node_loss = jnp.where(valid, logz - picked, 0.0)   # CE, ignore_index=-1
        maskf = mask.astype(jnp.float32)
        mmean = jnp.mean(maskf)
        maskf = maskf / jnp.where(mmean > 0, mmean, 1.0)       # guard all-zero mask
        loss = jnp.mean(per_node_loss * maskf)
        outputs = (loss,) + outputs

    return outputs


# ----------------------------------------------------------------------------
# Helpers: deterministic parameter init + plain-JAX reference.
# ----------------------------------------------------------------------------
def init_params(key, input_dim, hidden_dim, num_labels, num_gc_layer):
    dims = []
    if num_gc_layer == 1:
        dims.append((input_dim, num_labels))
    else:
        dims.append((input_dim, hidden_dim))
        for _ in range(1, num_gc_layer - 1):
            dims.append((hidden_dim, hidden_dim))
        dims.append((hidden_dim, num_labels))

    weights, biases = [], []
    for (din, dout) in dims:
        key, kw, kb = jax.random.split(key, 3)
        scale = 1.0 / jnp.sqrt(jnp.float32(din))
        weights.append(jax.random.uniform(kw, (din, dout), jnp.float32,
                                          minval=-scale, maxval=scale))
        biases.append(jax.random.uniform(kb, (dout,), jnp.float32,
                                         minval=-scale, maxval=scale))
    return weights, biases


def _reference_gcn(features, adj, weights, biases):
    h = features
    hs = []
    for l, (w, b) in enumerate(zip(weights, biases)):
        h = adj @ (h @ w) + b
        if l + 1 < len(weights):
            h = jax.nn.relu(h)
        hs.append(h)
    return hs


def _make_graph(k_feat, k_adj, n, input_dim):
    features = jax.random.normal(k_feat, (n, input_dim), jnp.float32)
    raw = (jax.random.uniform(k_adj, (n, n)) < 0.05).astype(jnp.float32)
    adj = jnp.maximum(raw, raw.T) + jnp.eye(n, dtype=jnp.float32)
    adj = adj / jnp.sum(adj, axis=-1, keepdims=True)
    return features, adj


if __name__ == "__main__":
    key = jax.random.PRNGKey(0)
    (k_feat, k_adj, k_lab, k_mask, k_par,
     k_feat2, k_adj2, k_par2) = jax.random.split(key, 8)

    # ---- Config 1: small-N fast path (A resident, grid = (2, 1)) -----------
    N, INPUT_DIM, HIDDEN_DIM, NUM_LABELS, NUM_GC_LAYER = 256, 32, 32, 8, 2
    features, adj = _make_graph(k_feat, k_adj, N, INPUT_DIM)
    labels = jax.random.randint(k_lab, (N,), minval=-1, maxval=NUM_LABELS)
    mask = (jax.random.uniform(k_mask, (N,)) < 0.6).astype(jnp.float32)
    weights, biases = init_params(k_par, INPUT_DIM, HIDDEN_DIM, NUM_LABELS,
                                  NUM_GC_LAYER)

    forward = jax.jit(custom_gcn_forward, static_argnames=("flag",))
    loss, preds, all_hidden = forward(features, adj, weights, biases,
                                      mask=mask, labels=labels, flag="Train")
    jax.block_until_ready(loss)
    jax.block_until_ready(preds)
    for h in all_hidden:
        jax.block_until_ready(h)

    ref_hs = _reference_gcn(features, adj, weights, biases)
    for l in range(NUM_GC_LAYER):
        err = float(jnp.max(jnp.abs(all_hidden[l + 1] - ref_hs[l])))
        assert err < 5e-2, f"config1 layer {l}: max abs err {err}"

    # ---- Config 2: streamed multi-tile path (3 layers, 3 row tiles, ---------
    # ----            Buffered(3) A pipeline, support parity swap)   ---------
    N2, LAYERS2 = 384, 3
    features2, adj2 = _make_graph(k_feat2, k_adj2, N2, INPUT_DIM)
    weights2, biases2 = init_params(k_par2, INPUT_DIM, HIDDEN_DIM, NUM_LABELS,
                                    LAYERS2)
    tiled = jax.jit(lambda f, a, w, b:
                    fused_gcn_layers(f, a, w, b, force_tile_m=128)[0])
    h_all2 = tiled(features2, adj2, weights2, biases2)
    jax.block_until_ready(h_all2)

    ref_hs2 = _reference_gcn(features2, adj2, weights2, biases2)
    dims2 = [int(w.shape[1]) for w in weights2]
    for l in range(LAYERS2):
        got = h_all2[l, :N2, : dims2[l]].astype(jnp.float32)
        err = float(jnp.max(jnp.abs(got - ref_hs2[l])))
        assert err < 5e-2, f"config2 layer {l}: max abs err {err}"

    print("KERNEL_OK")
</pallas_src>

<mosaic_0001>
module attributes {stable_mosaic.version = 11 : i64} {
  func.func @_fused_gcn_kernel(%arg0: i32, %arg1: i32, %arg2: memref<256x128xbf16, #tpu.memory_space<any>>, %arg3: memref<256x256xbf16, #tpu.memory_space<vmem>>, %arg4: memref<128x128xbf16, #tpu.memory_space<vmem>>, %arg5: memref<1x128x128xbf16, #tpu.memory_space<vmem>>, %arg6: memref<1x1x128xf32, #tpu.memory_space<vmem>>, %arg7: memref<1x256x128xbf16, #tpu.memory_space<vmem>>, %arg8: memref<2x256x128xbf16, #tpu.memory_space<vmem>>) attributes {dimension_semantics = [#tpu.dimension_semantics<arbitrary>, #tpu.dimension_semantics<arbitrary>], iteration_bounds = array<i64: 2, 1>, scalar_prefetch = 0 : i64, scratch_operands = 1 : i64, tpu.core_type = #tpu.core_type<tc>, window_params = [{}, {transform_indices = @transform_1, window_bounds = array<i64: 256, 256>}, {pipeline_mode = #tpu.pipeline_mode<synchronous>, transform_indices = @transform_2, window_bounds = array<i64: 128, 128>}, {transform_indices = @transform_3, window_bounds = array<i64: 1, 128, 128>}, {transform_indices = @transform_4, window_bounds = array<i64: 1, 1, 128>}, {transform_indices = @transform_5, window_bounds = array<i64: 1, 256, 128>}]} {
    %c2_i32 = arith.constant 2 : i32
    %c0_i32 = arith.constant 0 : i32
    %0 = arith.cmpi eq, %c2_i32, %c0_i32 : i32
    %c1_i32 = arith.constant 1 : i32
    %1 = arith.select %0, %c1_i32, %c2_i32 : i32
    %2 = arith.remsi %arg0, %1 : i32
    %c0_i32_0 = arith.constant 0 : i32
    %3 = arith.cmpi ne, %2, %c0_i32_0 : i32
    %c0_i32_1 = arith.constant 0 : i32
    %4 = arith.cmpi slt, %2, %c0_i32_1 : i32
    %c0_i32_2 = arith.constant 0 : i32
    %5 = arith.cmpi slt, %1, %c0_i32_2 : i32
    %6 = arith.xori %4, %5 : i1
    %7 = arith.andi %6, %3 : i1
    %8 = arith.addi %2, %1 : i32
    %9 = arith.select %7, %8, %2 : i32
    %c1_i32_3 = arith.constant 1 : i32
    %10 = arith.subi %c1_i32_3, %9 : i32
    %c0_i32_4 = arith.constant 0 : i32
    %11 = arith.cmpi eq, %arg0, %c0_i32_4 : i32
    %c0_i32_5 = arith.constant 0 : i32
    %12 = arith.cmpi eq, %arg1, %c0_i32_5 : i32
    %13 = arith.andi %11, %12 : i1
    %14 = arith.extui %13 : i1 to i32
    %c0_i32_6 = arith.constant 0 : i32
    %15 = arith.cmpi ne, %14, %c0_i32_6 : i32
    scf.if %15 {
      %c1_i32_22 = arith.constant 1 : i32
      "tpu.region"() ({
        %46 = tpu.sem_alloc : memref<!tpu.dma_semaphore, #tpu.memory_space<semaphore_mem>>
        %c0_i32_31 = arith.constant 0 : i32
        %c0_i32_32 = arith.constant 0 : i32
        %47 = tpu.memref_slice %arg8[%c1_i32_22, %c0_i32_31, %c0_i32_32] : memref<2x256x128xbf16, #tpu.memory_space<vmem>> -> memref<1x256x128xbf16, #tpu.memory_space<vmem>>
        %48 = tpu.memref_squeeze %47 : memref<1x256x128xbf16, #tpu.memory_space<vmem>> -> memref<256x128xbf16, #tpu.memory_space<vmem>>
        tpu.enqueue_dma source(%arg2 : memref<256x128xbf16, #tpu.memory_space<any>>) target(%48 : memref<256x128xbf16, #tpu.memory_space<vmem>>) target_semaphore(%46 : memref<!tpu.dma_semaphore, #tpu.memory_space<semaphore_mem>>)
        %c0_i32_33 = arith.constant 0 : i32
        %c0_i32_34 = arith.constant 0 : i32
        %49 = tpu.memref_slice %arg8[%c1_i32_22, %c0_i32_33, %c0_i32_34] : memref<2x256x128xbf16, #tpu.memory_space<vmem>> -> memref<1x256x128xbf16, #tpu.memory_space<vmem>>
        %50 = tpu.memref_squeeze %49 : memref<1x256x128xbf16, #tpu.memory_space<vmem>> -> memref<256x128xbf16, #tpu.memory_space<vmem>>
        tpu.wait_dma2 semaphore(%46 : memref<!tpu.dma_semaphore, #tpu.memory_space<semaphore_mem>>) src(%arg2 : memref<256x128xbf16, #tpu.memory_space<any>>) dst(%50 : memref<256x128xbf16, #tpu.memory_space<vmem>>)
        tpu.yield
      }) : () -> ()
      %c1 = arith.constant 1 : index
      %c0_23 = arith.constant 0 : index
      %c0_24 = arith.constant 0 : index
      %38 = vector.load %arg8[%c1, %c0_23, %c0_24] : memref<2x256x128xbf16, #tpu.memory_space<vmem>>, vector<1x256x128xbf16>
      %39 = vector.shape_cast %38 : vector<1x256x128xbf16> to vector<256x128xbf16>
      %c0_25 = arith.constant 0 : index
      %c0_26 = arith.constant 0 : index
      %40 = vector.load %arg4[%c0_25, %c0_26] : memref<128x128xbf16, #tpu.memory_space<vmem>>, vector<128x128xbf16>
      %cst_27 = arith.constant dense<0.000000e+00> : vector<256x128xf32>
      %41 = tpu.matmul %39, %40, %cst_27 {dimension_numbers = #tpu.dot_dimension_numbers<[1], [0], [0], [1], [0, 0, 1, 1], [], []>} : vector<256x128xbf16>, vector<128x128xbf16>, vector<256x128xf32> -> vector<256x128xf32>
      %42 = arith.truncf %41 : vector<256x128xf32> to vector<256x128xbf16>
      %c0_28 = arith.constant 0 : index
      %c0_29 = arith.constant 0 : index
      %c0_30 = arith.constant 0 : index
      %43 = vector.load %arg8[%c0_28, %c0_29, %c0_30] : memref<2x256x128xbf16, #tpu.memory_space<vmem>>, vector<1x256x128xbf16>
      %44 = vector.shape_cast %43 : vector<1x256x128xbf16> to vector<256x128xbf16>
      %45 = vector.shape_cast %42 : vector<256x128xbf16> to vector<1x256x128xbf16>
      tpu.vector_store %arg8[%c0_28, %c0_29, %c0_30], %45 {strides = array<i32>} : memref<2x256x128xbf16, #tpu.memory_space<vmem>>, vector<1x256x128xbf16>,
    } else {
    }
    %c0 = arith.constant 0 : index
    %c0_7 = arith.constant 0 : index
    %16 = vector.load %arg3[%c0, %c0_7] : memref<256x256xbf16, #tpu.memory_space<vmem>>, vector<256x256xbf16>
    %17 = arith.index_cast %9 : i32 to index
    %c0_8 = arith.constant 0 : index
    %c0_9 = arith.constant 0 : index
    %18 = vector.load %arg8[%17, %c0_8, %c0_9] : memref<2x256x128xbf16, #tpu.memory_space<vmem>>, vector<1x256x128xbf16>
    %19 = vector.shape_cast %18 : vector<1x256x128xbf16> to vector<256x128xbf16>
    %cst = arith.constant dense<0.000000e+00> : vector<256x128xf32>
    %20 = tpu.matmul %16, %19, %cst {dimension_numbers = #tpu.dot_dimension_numbers<[1], [0], [0], [1], [0, 0, 1, 1], [], []>} : vector<256x256xbf16>, vector<256x128xbf16>, vector<256x128xf32> -> vector<256x128xf32>
    %c0_10 = arith.constant 0 : index
    %c0_11 = arith.constant 0 : index
    %c0_12 = arith.constant 0 : index
    %21 = vector.load %arg6[%c0_10, %c0_11, %c0_12] : memref<1x1x128xf32, #tpu.memory_space<vmem>>, vector<1x1x128xf32>
    %22 = vector.shape_cast %21 : vector<1x1x128xf32> to vector<1x128xf32>
    %23 = vector.broadcast %22 : vector<1x128xf32> to vector<256x128xf32>
    %24 = arith.addf %20, %23 : vector<256x128xf32>
    %c1_i32_13 = arith.constant 1 : i32
    %25 = arith.addi %arg0, %c1_i32_13 : i32
    %c2_i32_14 = arith.constant 2 : i32
    %26 = arith.cmpi slt, %25, %c2_i32_14 : i32
    %cst_15 = arith.constant 0.000000e+00 : f32
    %27 = vector.broadcast %cst_15 : f32 to vector<256x128xf32>
    %28 = arith.maximumf %24, %27 : vector<256x128xf32>
    %29 = arith.select %26, %28, %24 : vector<256x128xf32>
    %30 = arith.truncf %29 : vector<256x128xf32> to vector<256x128xbf16>
    %c0_16 = arith.constant 0 : index
    %c0_17 = arith.constant 0 : index
    %c0_18 = arith.constant 0 : index
    %31 = vector.load %arg7[%c0_16, %c0_17, %c0_18] : memref<1x256x128xbf16, #tpu.memory_space<vmem>>, vector<1x256x128xbf16>
    %32 = vector.shape_cast %31 : vector<1x256x128xbf16> to vector<256x128xbf16>
    %33 = vector.shape_cast %30 : vector<256x128xbf16> to vector<1x256x128xbf16>
    tpu.vector_store %arg7[%c0_16, %c0_17, %c0_18], %33 {strides = array<i32>} : memref<1x256x128xbf16, #tpu.memory_space<vmem>>, vector<1x256x128xbf16>,
    %c1_i32_19 = arith.constant 1 : i32
    %34 = arith.addi %arg0, %c1_i32_19 : i32
    %c2_i32_20 = arith.constant 2 : i32
    %35 = arith.cmpi slt, %34, %c2_i32_20 : i32
    %36 = arith.extui %35 : i1 to i32
    %c0_i32_21 = arith.constant 0 : i32
    %37 = arith.cmpi ne, %36, %c0_i32_21 : i32
    scf.if %37 {
      %c256_i32 = arith.constant 256 : i32
      %38 = arith.muli %arg1, %c256_i32 : i32
      %39 = tpu.assume_multiple %38, 256 : i32
      %40 = arith.truncf %29 : vector<256x128xf32> to vector<256x128xbf16>
      %c0_22 = arith.constant 0 : index
      %c0_23 = arith.constant 0 : index
      %c0_24 = arith.constant 0 : index
      %41 = vector.load %arg5[%c0_22, %c0_23, %c0_24] : memref<1x128x128xbf16, #tpu.memory_space<vmem>>, vector<1x128x128xbf16>
      %42 = vector.shape_cast %41 : vector<1x128x128xbf16> to vector<128x128xbf16>
      %cst_25 = arith.constant dense<0.000000e+00> : vector<256x128xf32>
      %43 = tpu.matmul %40, %42, %cst_25 {dimension_numbers = #tpu.dot_dimension_numbers<[1], [0], [0], [1], [0, 0, 1, 1], [], []>} : vector<256x128xbf16>, vector<128x128xbf16>, vector<256x128xf32> -> vector<256x128xf32>
      %44 = arith.truncf %43 : vector<256x128xf32> to vector<256x128xbf16>
      %45 = arith.index_cast %10 : i32 to index
      %46 = arith.index_cast %39 : i32 to index
      %c0_26 = arith.constant 0 : index
      %47 = vector.load %arg8[%45, %46, %c0_26] : memref<2x256x128xbf16, #tpu.memory_space<vmem>>, vector<1x256x128xbf16>
      %48 = vector.shape_cast %47 : vector<1x256x128xbf16> to vector<256x128xbf16>
      %49 = vector.shape_cast %44 : vector<256x128xbf16> to vector<1x256x128xbf16>
      tpu.vector_store %arg8[%45, %46, %c0_26], %49 {strides = array<i32>} : memref<2x256x128xbf16, #tpu.memory_space<vmem>>, vector<1x256x128xbf16>,
    } else {
    }
    return
  }
  func.func @transform_1(%arg0: i32, %arg1: i32) -> (i32, i32) {
    %c0_i32 = arith.constant 0 : i32
    %c0_i32_0 = arith.constant 0 : i32
    return %arg1, %c0_i32 : i32, i32
  }
  func.func @transform_2(%arg0: i32, %arg1: i32) -> (i32, i32) {
    %c0_i32 = arith.constant 0 : i32
    %c0_i32_0 = arith.constant 0 : i32
    %c0_i32_1 = arith.constant 0 : i32
    return %c0_i32, %c0_i32_0 : i32, i32
  }
  func.func @transform_3(%arg0: i32, %arg1: i32) -> (i32, i32, i32) {
    %c0_i32 = arith.constant 0 : i32
    %c0_i32_0 = arith.constant 0 : i32
    %c0_i32_1 = arith.constant 0 : i32
    return %arg0, %c0_i32, %c0_i32_0 : i32, i32, i32
  }
  func.func @transform_4(%arg0: i32, %arg1: i32) -> (i32, i32, i32) {
    %c0_i32 = arith.constant 0 : i32
    %c0_i32_0 = arith.constant 0 : i32
    %c0_i32_1 = arith.constant 0 : i32
    return %arg0, %c0_i32, %c0_i32_0 : i32, i32, i32
  }
  func.func @transform_5(%arg0: i32, %arg1: i32) -> (i32, i32, i32) {
    %c0_i32 = arith.constant 0 : i32
    %c0_i32_0 = arith.constant 0 : i32
    return %arg0, %arg1, %c0_i32 : i32, i32, i32
  }
}

</mosaic_0001>

<bundles_post_ra>
// kernel: custom_gcn_forward.1
= control target key start
LH: loop header
LB: loop body
LE: loop exit
PB: predicated region body
PF: predicated region fallthrough
CT: control target
= control target key end

     0   :  { %s2308_s18 = smov 0   ;;  %s2310_s19 = smov 0   ;;  %s2764_s0 = inlined_call_operand.vmem [shape: bf16[256,128], index: 0, kind: input, shape index: {}]   ;;  %s2765_s1 = inlined_call_operand.vmem [shape: bf16[256,256], index: 1, kind: input, shape index: {}]   ;;  %s2766_s2 = inlined_call_operand.vmem [shape: bf16[128,128], index: 2, kind: input, shape index: {}]   ;;  %s2767_s3 = inlined_call_operand.vmem [shape: bf16[2,128,128], index: 3, kind: input, shape index: {}]   ;;  %s2768_s4 = inlined_call_operand.vmem [shape: f32[2,1,128], index: 4, kind: input, shape index: {}]   ;;  %s2769_s5 = inlined_call_operand.vmem [shape: bf16[2,256,128], index: 5, kind: output, shape index: {}]  }
   0x1   :  { %s2312_s20 = smov 0  }
   0x2 LB: > { %s27_s21 = sadd.s32 1, %s2272_s19  ;;  %p1631_p0 = scmp.ge.s32.totalorder %s2276_s20, 1  ;;  %s2276_s20 = sphi %s2312_s20, %s15_s20   ;;  %s2272_s19 = sphi %s2310_s19, %s2771_s19   ;;  %s2268_s18 = sphi %s2308_s18, %s2770_s18  }
   0x3   : > { %p29_p1 = scmp.ge.s32.totalorder %s27_s21, 2  ;;  %p197_p2 = scmp.lt.s32.totalorder %s2276_s20, 3 }
   0x5   : > { %s2773_s21 = smov (%p29_p1, %s27_s21), 0  ;;  %p198_p3 = pnand %p1631_p0, %p197_p2 }
   0x6   : > { %p243_p4 = scmp.lt.s32.totalorder (!%p198_p3), %s2268_s18, 1  ;;  %s263_s22 = ssub.s32 (!%p198_p3), 0, %s2268_s18 }
   0x7   : > { %201 = sbr.rel (%p198_p3) target bundleno = 895 (0x37f), region = 36  ;;  %p275_p5 = scmp.eq.s32.totalorder (!%p198_p3), %s2268_s18, 0 }
   0x8   : > { %p262_p6 = scmp.lt.s32.totalorder (!%p198_p3), %s2268_s18, 0  ;;  %s1636_s24 = smin.u32 (!%p198_p3), %s2268_s18, %s263_s22 }
   0x9   : > { %s265_s11 = sand.u32 (!%p198_p3), 1, %s1636_s24  }
   0xa   : > { %s266_s12 = ssub.s32 (!%p198_p3), 0, %s265_s11 }
   0xe   : > { %s2332_s23 = scalar_select %p243_p4, %s2268_s18, 1 }
   0xf   : > { %s2775_s12 = smov (!%p262_p6, %s266_s12), %s265_s11  ;;  %280 = sbr.rel (!%p275_p5) target bundleno = 308 (0x134), region = 40 }
  0x10   : > { %s1728_s25 = sshll.u32 %s2332_s23, 6  ;;  %s250_s28 = scalar_lea.vmem %s2768_s4, %s2332_s23 }
  0x11   : > { %s2344_s6 = scalar_lea.vmem %s2767_s3, %s1728_s25  ;;  %s1729_s7 = sshll.u32 %s2332_s23, 7 }
  0x12   : > { %s2350_s10 = scalar_lea.vmem %s2769_s5, %s1729_s7  ;;  %p1638_p7 = scmp.lt.s32.totalorder %s2775_s12, 0 }
  0x13   : > { %s272_s13 = sadd.s32 2, %s2775_s12 }
  0x14   : > { %s2777_s13 = smov (!%p1638_p7, %s272_s13), %s2775_s12 }
  0x15   : > { %s274_s14 = ssub.s32 1, %s2777_s13 }
  0x16   : > { %v314_v0 = vld [vmem:[%s2764_s0] sm:$0xff]  ;;  %v316_v1 = vld [vmem:[%s2764_s0 + $0x8] sm:$0xff]  ;;  %v318_v2 = vld [vmem:[%s2764_s0 + $0x10] sm:$0xff] }
  0x17   : > { %315 = vst [vmem:[#allocation2 + $0x80] sm:$0xff] %v314_v0  ;;  %317 = vst [vmem:[#allocation2 + $0x88] sm:$0xff] %v316_v1  ;;  %v320_v3 = vld [vmem:[%s2764_s0 + $0x18] sm:$0xff]  ;;  %v322_v4 = vld [vmem:[%s2764_s0 + $0x20] sm:$0xff] }
  0x18   : > { %319 = vst [vmem:[#allocation2 + $0x90] sm:$0xff] %v318_v2  ;;  %v324_v5 = vld [vmem:[%s2764_s0 + $0x28] sm:$0xff]  ;;  %321 = vst [vmem:[#allocation2 + $0x98] sm:$0xff] %v320_v3  ;;  %v326_v6 = vld [vmem:[%s2764_s0 + $0x30] sm:$0xff] }
  0x19   : > { %323 = vst [vmem:[#allocation2 + $0xa0] sm:$0xff] %v322_v4  ;;  %325 = vst [vmem:[#allocation2 + $0xa8] sm:$0xff] %v324_v5  ;;  %v328_v7 = vld [vmem:[%s2764_s0 + $0x38] sm:$0xff]  ;;  %v330_v8 = vld [vmem:[%s2764_s0 + $0x40] sm:$0xff] }
  0x1a   : > { %327 = vst [vmem:[#allocation2 + $0xb0] sm:$0xff] %v326_v6  ;;  %329 = vst [vmem:[#allocation2 + $0xb8] sm:$0xff] %v328_v7  ;;  %v332_v9 = vld [vmem:[%s2764_s0 + $0x48] sm:$0xff]  ;;  %v334_v10 = vld [vmem:[%s2764_s0 + $0x50] sm:$0xff] }
  0x1b   : > { %331 = vst [vmem:[#allocation2 + $0xc0] sm:$0xff] %v330_v8  ;;  %v336_v11 = vld [vmem:[%s2764_s0 + $0x58] sm:$0xff]  ;;  %333 = vst [vmem:[#allocation2 + $0xc8] sm:$0xff] %v332_v9  ;;  %v338_v12 = vld [vmem:[%s2764_s0 + $0x60] sm:$0xff] }
  0x1c   : > { %335 = vst [vmem:[#allocation2 + $0xd0] sm:$0xff] %v334_v10  ;;  %337 = vst [vmem:[#allocation2 + $0xd8] sm:$0xff] %v336_v11  ;;  %v340_v13 = vld [vmem:[%s2764_s0 + $0x68] sm:$0xff]  ;;  %v342_v14 = vld [vmem:[%s2764_s0 + $0x70] sm:$0xff] }
  0x1d   : > { %339 = vst [vmem:[#allocation2 + $0xe0] sm:$0xff] %v338_v12  ;;  %341 = vst [vmem:[#allocation2 + $0xe8] sm:$0xff] %v340_v13  ;;  %v344_v15 = vld [vmem:[%s2764_s0 + $0x78] sm:$0xff] }
  0x1e   : > { %343 = vst [vmem:[#allocation2 + $0xf0] sm:$0xff] %v342_v14  ;;  %345 = vst [vmem:[#allocation2 + $0xf8] sm:$0xff] %v344_v15 }
  0x1f   : > { %353 = vsyncadd [#allocation3], 2048 }
  0x20   : > { %2264 = dma.done.wait [#allocation3], 2048 }
  0x21   : > { %2265 = vsyncadd [#allocation3], 4294965248  ;;  %v2188_v16 = vld [vmem:[%s2766_s2] sm:$0xff]   ;;  %v2189_v17 = vld [vmem:[%s2766_s2 + $0x8] sm:$0xff]  }
  0x22   : > { %2020 = vmatprep.subr.bf16.mxu0 %v2188_v16  ;;  %2116 = vmatprep.subr.bf16.mxu1 %v2188_v16  ;;  %v2190_v18 = vld [vmem:[%s2766_s2 + $0x10] sm:$0xff]   ;;  %v2191_v19 = vld [vmem:[%s2766_s2 + $0x18] sm:$0xff]   ;;  %v359_v20 = vld [vmem:[#allocation2 + $0x80] sm:$0xff] }
  0x23   : > { %2021 = vmatpush3.bf16.msra.mxu0 %v2188_v16  ;;  %2124 = vmatpush3.bf16.msra.mxu1 %v2188_v16  ;;  %v367_v21 = vld [vmem:[#allocation2 + $0xc0] sm:$0xff]  ;;  %v2193_v23 = vld [vmem:[%s2766_s2 + $0x28] sm:$0xff]   ;;  %v2194_v24 = vld [vmem:[%s2766_s2 + $0x30] sm:$0xff]  }
  0x24   : > { %2022 = vmatprep.subr.bf16.mxu0 %v2189_v17  ;;  %2117 = vmatprep.subr.bf16.mxu1 %v2189_v17  ;;  %v2192_v22 = vld [vmem:[%s2766_s2 + $0x20] sm:$0xff]   ;;  %v2195_v25 = vld [vmem:[%s2766_s2 + $0x38] sm:$0xff]   ;;  %v360_v26 = vld [vmem:[#allocation2 + $0x88] sm:$0xff] }
  0x25   : > { %2036 = vmatprep.mubr.bf16.mxu0 %v359_v20  ;;  %2052 = vmatprep.mubr.bf16.mxu1 %v367_v21  ;;  %v368_v27 = vld [vmem:[#allocation2 + $0xc8] sm:$0xff]  ;;  %v361_v28 = vld [vmem:[#allocation2 + $0x90] sm:$0xff]  ;;  %v362_v30 = vld [vmem:[#allocation2 + $0x98] sm:$0xff] }
  0x26   : > { %v369_v29 = vld [vmem:[#allocation2 + $0xd0] sm:$0xff]  ;;  %v370_v31 = vld [vmem:[#allocation2 + $0xd8] sm:$0xff]  ;;  %v363_v32 = vld [vmem:[#allocation2 + $0xa0] sm:$0xff] }
  0x27   : > { %2023 = vmatpush3.bf16.msra.mxu0 %v2189_v17  ;;  %2125 = vmatpush3.bf16.msra.mxu1 %v2189_v17  ;;  %v371_v33 = vld [vmem:[#allocation2 + $0xe0] sm:$0xff]  ;;  %v364_v34 = vld [vmem:[#allocation2 + $0xa8] sm:$0xff]  ;;  %v365_v36 = vld [vmem:[#allocation2 + $0xb0] sm:$0xff] }
  0x28   : > { %2024 = vmatprep.subr.bf16.mxu0 %v2190_v18  ;;  %2118 = vmatprep.subr.bf16.mxu1 %v2190_v18  ;;  %v372_v35 = vld [vmem:[#allocation2 + $0xe8] sm:$0xff]  ;;  %v373_v37 = vld [vmem:[#allocation2 + $0xf0] sm:$0xff]  ;;  %v366_v38 = vld [vmem:[#allocation2 + $0xb8] sm:$0xff] }
  0x29   : > { %v374_v39 = vld [vmem:[#allocation2 + $0xf8] sm:$0xff] }
  0x2b   : > { %2025 = vmatpush3.bf16.msra.mxu0 %v2190_v18  ;;  %2126 = vmatpush3.bf16.msra.mxu1 %v2190_v18 }
  0x2c   : > { %2026 = vmatprep.subr.bf16.mxu0 %v2191_v19  ;;  %2119 = vmatprep.subr.bf16.mxu1 %v2191_v19 }
  0x2f   : > { %2027 = vmatpush3.bf16.msra.mxu0 %v2191_v19  ;;  %2127 = vmatpush3.bf16.msra.mxu1 %v2191_v19 }
  0x30   : > { %2028 = vmatprep.subr.bf16.mxu0 %v2192_v22  ;;  %2120 = vmatprep.subr.bf16.mxu1 %v2192_v22 }
  0x33   : > { %2029 = vmatpush3.bf16.msra.mxu0 %v2192_v22  ;;  %2128 = vmatpush3.bf16.msra.mxu1 %v2192_v22 }
  0x34   : > { %2030 = vmatprep.subr.bf16.mxu0 %v2193_v23  ;;  %2121 = vmatprep.subr.bf16.mxu1 %v2193_v23 }
  0x37   : > { %2031 = vmatpush3.bf16.msra.mxu0 %v2193_v23  ;;  %2129 = vmatpush3.bf16.msra.mxu1 %v2193_v23 }
  0x38   : > { %2032 = vmatprep.subr.bf16.mxu0 %v2194_v24  ;;  %2122 = vmatprep.subr.bf16.mxu1 %v2194_v24 }
  0x3b   : > { %2033 = vmatpush3.bf16.msra.mxu0 %v2194_v24  ;;  %2130 = vmatpush3.bf16.msra.mxu1 %v2194_v24 }
  0x3c   : > { %2034 = vmatprep.subr.bf16.mxu0 %v2195_v25  ;;  %2123 = vmatprep.subr.bf16.mxu1 %v2195_v25 }
  0x3f   : > { %2035 = vmatpush3.bf16.msra.mxu0 %v2195_v25  ;;  %2131 = vmatpush3.bf16.msra.mxu1 %v2195_v25 }
  0x42   : > { %2037 = vmatmul.mubr.bf16.vlgmr.msra.gmra.mrb[0].mxu0 %v360_v26  ;;  %2053 = vmatmul.mubr.bf16.vlgmr.msra.gmra.mrb[0].mxu1 %v368_v27 }
  0x43   : > { %2040 = vmatprep.mubr.bf16.mxu0 %v361_v28  ;;  %2056 = vmatprep.mubr.bf16.mxu1 %v369_v29 }
  0x4a   : > { %2041 = vmatmul.mubr.bf16.gmra.mrb[4].mxu0 %v362_v30  ;;  %2057 = vmatmul.mubr.bf16.gmra.mrb[4].mxu1 %v370_v31 }
  0x4b   : > { %2044 = vmatprep.mubr.bf16.mxu0 %v363_v32  ;;  %2060 = vmatprep.mubr.bf16.mxu1 %v371_v33 }
  0x52   : > { %2045 = vmatmul.mubr.bf16.gmra.mrb[8].mxu0 %v364_v34  ;;  %2061 = vmatmul.mubr.bf16.gmra.mrb[8].mxu1 %v372_v35 }
  0x53   : > { %2048 = vmatprep.mubr.bf16.mxu0 %v365_v36  ;;  %2064 = vmatprep.mubr.bf16.mxu1 %v373_v37 }
  0x5a   : > { %2049 = vmatmul.mubr.bf16.gmra.mrb[12].mxu0 %v366_v38  ;;  %2065 = vmatmul.mubr.bf16.gmra.mrb[12].mxu1 %v374_v39 }
 0x115   : > { %v2038_v40 = vpop.f32.mrb[0].mxu0  ;;  %v2054_v41 = vpop.f32.mrb[0].mxu1 }
 0x116   : > { %v473_v42 = vpop.f32.mrb[1].mxu0  ;;  %v537_v43 = vpop.f32.mrb[1].mxu1 }
 0x117   : > { %v2039_v44 = vpop.f32.mrb[2].mxu0  ;;  %v2055_v45 = vpop.f32.mrb[2].mxu1 }
 0x118   : > { %v601_v46 = vpack.c.bf16 %v2039_v44, %v2038_v40  ;;  %v609_v47 = vpack.c.bf16 %v2055_v45, %v2054_v41  ;;  %v476_v48 = vpop.f32.mrb[3].mxu0  ;;  %v540_v49 = vpop.f32.mrb[3].mxu1 }
 0x119   : > { %v600_v50 = vpack.c.bf16 %v476_v48, %v473_v42  ;;  %v608_v51 = vpack.c.bf16 %v540_v49, %v537_v43 }
 0x11a   : > { %617 = vst [vmem:[#allocation2 + $0x8] sm:$0xff] %v601_v46  ;;  %625 = vst [vmem:[#allocation2 + $0x48] sm:$0xff] %v609_v47 }
 0x11b   : > { %616 = vst [vmem:[#allocation2] sm:$0xff] %v600_v50  ;;  %624 = vst [vmem:[#allocation2 + $0x40] sm:$0xff] %v608_v51 }
 0x11d   : > { %v2042_v52 = vpop.f32.mrb[4].mxu0  ;;  %v2058_v53 = vpop.f32.mrb[4].mxu1 }
 0x11e   : > { %v489_v54 = vpop.f32.mrb[5].mxu0  ;;  %v553_v55 = vpop.f32.mrb[5].mxu1 }
 0x11f   : > { %v2043_v56 = vpop.f32.mrb[6].mxu0  ;;  %v2059_v57 = vpop.f32.mrb[6].mxu1 }
 0x120   : > { %v603_v58 = vpack.c.bf16 %v2043_v56, %v2042_v52  ;;  %v611_v59 = vpack.c.bf16 %v2059_v57, %v2058_v53  ;;  %v492_v60 = vpop.f32.mrb[7].mxu0  ;;  %v556_v61 = vpop.f32.mrb[7].mxu1 }
 0x121   : > { %v602_v62 = vpack.c.bf16 %v492_v60, %v489_v54  ;;  %v610_v63 = vpack.c.bf16 %v556_v61, %v553_v55 }
 0x122   : > { %619 = vst [vmem:[#allocation2 + $0x18] sm:$0xff] %v603_v58  ;;  %627 = vst [vmem:[#allocation2 + $0x58] sm:$0xff] %v611_v59 }
 0x123   : > { %618 = vst [vmem:[#allocation2 + $0x10] sm:$0xff] %v602_v62  ;;  %626 = vst [vmem:[#allocation2 + $0x50] sm:$0xff] %v610_v63 }
 0x125   : > { %v2046_v0 = vpop.f32.mrb[8].mxu0  ;;  %v2062_v1 = vpop.f32.mrb[8].mxu1 }
 0x126   : > { %v505_v2 = vpop.f32.mrb[9].mxu0  ;;  %v569_v3 = vpop.f32.mrb[9].mxu1 }
 0x127   : > { %v2047_v4 = vpop.f32.mrb[10].mxu0  ;;  %v2063_v5 = vpop.f32.mrb[10].mxu1 }
 0x128   : > { %v605_v6 = vpack.c.bf16 %v2047_v4, %v2046_v0  ;;  %v613_v7 = vpack.c.bf16 %v2063_v5, %v2062_v1  ;;  %v508_v8 = vpop.f32.mrb[11].mxu0  ;;  %v572_v9 = vpop.f32.mrb[11].mxu1 }
 0x129   : > { %v604_v10 = vpack.c.bf16 %v508_v8, %v505_v2  ;;  %v612_v11 = vpack.c.bf16 %v572_v9, %v569_v3 }
 0x12a   : > { %621 = vst [vmem:[#allocation2 + $0x28] sm:$0xff] %v605_v6  ;;  %629 = vst [vmem:[#allocation2 + $0x68] sm:$0xff] %v613_v7 }
 0x12b   : > { %620 = vst [vmem:[#allocation2 + $0x20] sm:$0xff] %v604_v10  ;;  %628 = vst [vmem:[#allocation2 + $0x60] sm:$0xff] %v612_v11 }
 0x12d   : > { %v2050_v12 = vpop.f32.mrb[12].mxu0  ;;  %v2066_v13 = vpop.f32.mrb[12].mxu1 }
 0x12e   : > { %v521_v14 = vpop.f32.mrb[13].mxu0  ;;  %v585_v15 = vpop.f32.mrb[13].mxu1 }
 0x12f   : > { %v2051_v16 = vpop.f32.mrb[14].mxu0  ;;  %v2067_v17 = vpop.f32.mrb[14].mxu1 }
 0x130   : > { %v607_v18 = vpack.c.bf16 %v2051_v16, %v2050_v12  ;;  %v615_v19 = vpack.c.bf16 %v2067_v17, %v2066_v13  ;;  %v524_v20 = vpop.f32.mrb[15].mxu0  ;;  %v588_v21 = vpop.f32.mrb[15].mxu1 }
 0x131   : > { %v606_v22 = vpack.c.bf16 %v524_v20, %v521_v14  ;;  %v614_v23 = vpack.c.bf16 %v588_v21, %v585_v15 }
 0x132   : > { %623 = vst [vmem:[#allocation2 + $0x38] sm:$0xff] %v607_v18  ;;  %631 = vst [vmem:[#allocation2 + $0x78] sm:$0xff] %v615_v19 }
 0x133   : > { %622 = vst [vmem:[#allocation2 + $0x30] sm:$0xff] %v606_v22  ;;  %630 = vst [vmem:[#allocation2 + $0x70] sm:$0xff] %v614_v23 }
 0x134 PF: > { %s1731_s22 = sshll.u32 %s2777_s13, 7  ;;  %v2198_v24 = vld [vmem:[%s2765_s1 + $0x4] ss:$8 sps:$4 sm:$0xff]   ;;  %v2196_v42 = vld [vmem:[%s2765_s1] ss:$8 sps:$4 sm:$0xff]   ;;  %s1011_s30 = sadd.s32 1, %s2268_s18 }
 0x135   : > { %s2433_s26 = scalar_lea.vmem [#allocation2], %s1731_s22  ;;  %882 = vmatprep.mubr.bf16.mxu0 %v2198_v24  ;;  %v2201_v30 = vld [vmem:[%s2765_s1 + $0x84] ss:$8 sps:$4 sm:$0xff]   ;;  %v2199_v43 = vld [vmem:[%s2765_s1 + $0x80] ss:$8 sps:$4 sm:$0xff]   ;;  %p1012_p8 = scmp.lt.s32.totalorder %s1011_s30, 2 }
 0x136   : > { %946 = vmatprep.mubr.bf16.mxu1 %v2201_v30  ;;  %v2202_v44 = vld [vmem:[%s2765_s1 + $0x14] ss:$8 sps:$4 sm:$0xff]   ;;  %v2206_v46 = vld [vmem:[%s2765_s1 + $0x10] ss:$8 sps:$4 sm:$0xff]   ;;  %v2208_v48 = vld [vmem:[%s2765_s1 + $0x24] ss:$8 sps:$4 sm:$0xff]  }
 0x137   : > { %v2204_v45 = vld [vmem:[%s2765_s1 + $0x94] ss:$8 sps:$4 sm:$0xff]   ;;  %v2207_v47 = vld [vmem:[%s2765_s1 + $0x90] ss:$8 sps:$4 sm:$0xff]   ;;  %v2210_v49 = vld [vmem:[%s2765_s1 + $0xa4] ss:$8 sps:$4 sm:$0xff]  }
 0x138   : > { %v2212_v50 = vld [vmem:[%s2765_s1 + $0x20] ss:$8 sps:$4 sm:$0xff]   ;;  %v2214_v52 = vld [vmem:[%s2765_s1 + $0x34] ss:$8 sps:$4 sm:$0xff]   ;;  %v2218_v54 = vld [vmem:[%s2765_s1 + $0x30] ss:$8 sps:$4 sm:$0xff]  }
 0x139   : > { %v2213_v51 = vld [vmem:[%s2765_s1 + $0xa0] ss:$8 sps:$4 sm:$0xff]   ;;  %v2216_v53 = vld [vmem:[%s2765_s1 + $0xb4] ss:$8 sps:$4 sm:$0xff]   ;;  %v2219_v55 = vld [vmem:[%s2765_s1 + $0xb0] ss:$8 sps:$4 sm:$0xff]  }
 0x13a   : > { %v675_v25 = vld [vmem:[%s2433_s26 + $0x40] sm:$0xff]  ;;  %v676_v27 = vld [vmem:[%s2433_s26 + $0x48] sm:$0xff]  ;;  %v677_v29 = vld [vmem:[%s2433_s26 + $0x50] sm:$0xff]  ;;  %s1045_s7 = scalar_select %p1012_p8, 1, 0 }
 0x13b   : > { %v667_v26 = vld [vmem:[%s2433_s26] sm:$0xff]  ;;  %1884 = vmatprep.subr.bf16.mxu0 %v675_v25  ;;  %2132 = vmatprep.subr.bf16.mxu1 %v675_v25  ;;  %v668_v28 = vld [vmem:[%s2433_s26 + $0x8] sm:$0xff]  ;;  %v669_v31 = vld [vmem:[%s2433_s26 + $0x10] sm:$0xff]  ;;  %p1715_p9 = scmp.ge.s32.totalorder %s1011_s30, 2 }
 0x13c   : > { %1885 = vmatpush3.bf16.msra.mxu0 %v667_v26  ;;  %2140 = vmatpush3.bf16.msra.mxu1 %v667_v26  ;;  %v678_v32 = vld [vmem:[%s2433_s26 + $0x58] sm:$0xff]  ;;  %v679_v34 = vld [vmem:[%s2433_s26 + $0x60] sm:$0xff]  ;;  %v680_v36 = vld [vmem:[%s2433_s26 + $0x68] sm:$0xff]  ;;  %v2554_v14 = vstv %s1045_s7  ;;  %s1764_s18 = sshll.u32 (!%p1715_p9), %s274_s14, 7 }
 0x13d   : > { %1886 = vmatprep.subr.bf16.mxu0 %v676_v27  ;;  %2133 = vmatprep.subr.bf16.mxu1 %v676_v27  ;;  %v670_v33 = vld [vmem:[%s2433_s26 + $0x18] sm:$0xff]  ;;  %v671_v35 = vld [vmem:[%s2433_s26 + $0x20] sm:$0xff]  ;;  %v672_v37 = vld [vmem:[%s2433_s26 + $0x28] sm:$0xff]  ;;  %vm1047_vm0 = vcmp.eq.s32.totalorder %v2554_v14, 1  ;;  %s2737_s23 = scalar_lea.vmem (!%p1715_p9), [#allocation2], %s1764_s18 }
 0x13e   : > { %v681_v38 = vld [vmem:[%s2433_s26 + $0x70] sm:$0xff]  ;;  %v682_v40 = vld [vmem:[%s2433_s26 + $0x78] sm:$0xff]  ;;  %v2220_v56 = vld [vmem:[%s2765_s1 + $0x44] ss:$8 sps:$4 sm:$0xff]  }
 0x13f   : > { %v673_v39 = vld [vmem:[%s2433_s26 + $0x30] sm:$0xff]  ;;  %v674_v41 = vld [vmem:[%s2433_s26 + $0x38] sm:$0xff]  ;;  %v2222_v57 = vld [vmem:[%s2765_s1 + $0xc4] ss:$8 sps:$4 sm:$0xff]  }
 0x140   : > { %1887 = vmatpush3.bf16.msra.mxu0 %v668_v28  ;;  %2141 = vmatpush3.bf16.msra.mxu1 %v668_v28  ;;  %v2224_v58 = vld [vmem:[%s2765_s1 + $0x40] ss:$8 sps:$4 sm:$0xff]   ;;  %v2226_v60 = vld [vmem:[%s2765_s1 + $0x54] ss:$8 sps:$4 sm:$0xff]   ;;  %v2230_v62 = vld [vmem:[%s2765_s1 + $0x50] ss:$8 sps:$4 sm:$0xff]  }
 0x141   : > { %1888 = vmatprep.subr.bf16.mxu0 %v677_v29  ;;  %2134 = vmatprep.subr.bf16.mxu1 %v677_v29  ;;  %v2225_v59 = vld [vmem:[%s2765_s1 + $0xc0] ss:$8 sps:$4 sm:$0xff]   ;;  %v2228_v61 = vld [vmem:[%s2765_s1 + $0xd4] ss:$8 sps:$4 sm:$0xff]   ;;  %v2231_v63 = vld [vmem:[%s2765_s1 + $0xd0] ss:$8 sps:$4 sm:$0xff]  }
 0x142   : > { %v2232_v0 = vld [vmem:[%s2765_s1 + $0x64] ss:$8 sps:$4 sm:$0xff]   ;;  %v2236_v2 = vld [vmem:[%s2765_s1 + $0x60] ss:$8 sps:$4 sm:$0xff]   ;;  %v2238_v4 = vld [vmem:[%s2765_s1 + $0x74] ss:$8 sps:$4 sm:$0xff]  }
 0x143   : > { %v2234_v1 = vld [vmem:[%s2765_s1 + $0xe4] ss:$8 sps:$4 sm:$0xff]   ;;  %v2237_v3 = vld [vmem:[%s2765_s1 + $0xe0] ss:$8 sps:$4 sm:$0xff]   ;;  %v2240_v5 = vld [vmem:[%s2765_s1 + $0xf4] ss:$8 sps:$4 sm:$0xff]  }
 0x144   : > { %1889 = vmatpush3.bf16.msra.mxu0 %v669_v31  ;;  %2142 = vmatpush3.bf16.msra.mxu1 %v669_v31  ;;  %v2242_v6 = vld [vmem:[%s2765_s1 + $0x70] ss:$8 sps:$4 sm:$0xff]   ;;  %v2552_v10 = vld [vmem:[%s250_s28] ss:$0 sm:$0xff] }
 0x145   : > { %1890 = vmatprep.subr.bf16.mxu0 %v678_v32  ;;  %2135 = vmatprep.subr.bf16.mxu1 %v678_v32  ;;  %v2243_v7 = vld [vmem:[%s2765_s1 + $0xf0] ss:$8 sps:$4 sm:$0xff]  }
 0x146   : > { %v2246_v14 = vld [vmem:[%s2344_s6 + $0x10] sm:$0xff] (!%p1715_p9)  }
 0x148   : > { %1891 = vmatpush3.bf16.msra.mxu0 %v670_v33  ;;  %2143 = vmatpush3.bf16.msra.mxu1 %v670_v33 }
 0x149   : > { %1892 = vmatprep.subr.bf16.mxu0 %v679_v34  ;;  %2136 = vmatprep.subr.bf16.mxu1 %v679_v34 }
 0x14c   : > { %1893 = vmatpush3.bf16.msra.mxu0 %v671_v35  ;;  %2144 = vmatpush3.bf16.msra.mxu1 %v671_v35 }
 0x14d   : > { %1894 = vmatprep.subr.bf16.mxu0 %v680_v36  ;;  %2137 = vmatprep.subr.bf16.mxu1 %v680_v36 }
 0x150   : > { %1895 = vmatpush3.bf16.msra.mxu0 %v672_v37  ;;  %2145 = vmatpush3.bf16.msra.mxu1 %v672_v37 }
 0x151   : > { %1896 = vmatprep.subr.bf16.mxu0 %v681_v38  ;;  %2138 = vmatprep.subr.bf16.mxu1 %v681_v38 }
 0x154   : > { %1897 = vmatpush3.bf16.msra.mxu0 %v673_v39  ;;  %2146 = vmatpush3.bf16.msra.mxu1 %v673_v39 }
 0x155   : > { %1898 = vmatprep.subr.bf16.mxu0 %v682_v40  ;;  %2139 = vmatprep.subr.bf16.mxu1 %v682_v40 }
 0x158   : > { %1899 = vmatpush3.bf16.msra.mxu0 %v674_v41  ;;  %2147 = vmatpush3.bf16.msra.mxu1 %v674_v41 }
 0x15b   : > { %883 = vmatmul.mubr.bf16.vlgmr.msra.gmra.mrb[0].mxu0 %v2196_v42  ;;  %947 = vmatmul.mubr.bf16.vlgmr.msra.gmra.mrb[0].mxu1 %v2199_v43 }
 0x15c   : > { %890 = vmatprep.mubr.bf16.mxu0 %v2202_v44  ;;  %954 = vmatprep.mubr.bf16.mxu1 %v2204_v45 }
 0x163   : > { %891 = vmatmul.mubr.bf16.gmra.mrb[4].mxu0 %v2206_v46  ;;  %955 = vmatmul.mubr.bf16.gmra.mrb[4].mxu1 %v2207_v47 }
 0x164   : > { %898 = vmatprep.mubr.bf16.mxu0 %v2208_v48  ;;  %962 = vmatprep.mubr.bf16.mxu1 %v2210_v49 }
 0x16b   : > { %899 = vmatmul.mubr.bf16.gmra.mrb[8].mxu0 %v2212_v50  ;;  %963 = vmatmul.mubr.bf16.gmra.mrb[8].mxu1 %v2213_v51 }
 0x16c   : > { %906 = vmatprep.mubr.bf16.mxu0 %v2214_v52  ;;  %970 = vmatprep.mubr.bf16.mxu1 %v2216_v53 }
 0x173   : > { %907 = vmatmul.mubr.bf16.gmra.mrb[12].mxu0 %v2218_v54  ;;  %971 = vmatmul.mubr.bf16.gmra.mrb[12].mxu1 %v2219_v55 }
 0x174   : > { %914 = vmatprep.mubr.bf16.mxu0 %v2220_v56  ;;  %978 = vmatprep.mubr.bf16.mxu1 %v2222_v57 }
 0x17b   : > { %915 = vmatmul.mubr.bf16.gmra.mrb[16].mxu0 %v2224_v58  ;;  %979 = vmatmul.mubr.bf16.gmra.mrb[16].mxu1 %v2225_v59 }
 0x17c   : > { %922 = vmatprep.mubr.bf16.mxu0 %v2226_v60  ;;  %986 = vmatprep.mubr.bf16.mxu1 %v2228_v61 }
 0x183   : > { %923 = vmatmul.mubr.bf16.gmra.mrb[20].mxu0 %v2230_v62  ;;  %987 = vmatmul.mubr.bf16.gmra.mrb[20].mxu1 %v2231_v63 }
 0x184   : > { %930 = vmatprep.mubr.bf16.mxu0 %v2232_v0  ;;  %994 = vmatprep.mubr.bf16.mxu1 %v2234_v1 }
 0x18b   : > { %931 = vmatmul.mubr.bf16.gmra.mrb[24].mxu0 %v2236_v2  ;;  %995 = vmatmul.mubr.bf16.gmra.mrb[24].mxu1 %v2237_v3 }
 0x18c   : > { %938 = vmatprep.mubr.bf16.mxu0 %v2238_v4  ;;  %1002 = vmatprep.mubr.bf16.mxu1 %v2240_v5 }
 0x193   : > { %939 = vmatmul.mubr.bf16.gmra.mrb[28].mxu0 %v2242_v6  ;;  %1003 = vmatmul.mubr.bf16.gmra.mrb[28].mxu1 %v2243_v7 }
 0x22e   : > { %v1900_v8 = vpop.f32.mrb[0].mxu0  ;;  %v1948_v9 = vpop.f32.mrb[0].mxu1 }
 0x22f   : > { %v1901_v11 = vpop.f32.mrb[1].mxu0  ;;  %v1949_v12 = vpop.f32.mrb[1].mxu1 }
 0x230   : > { %v1902_v13 = vadd.f32 %v1901_v11, %v1900_v8  ;;  %v1950_v15 = vadd.f32 %v1949_v12, %v1948_v9  ;;  %v1903_v16 = vpop.f32.mrb[2].mxu0  ;;  %v1951_v17 = vpop.f32.mrb[2].mxu1 }
 0x231   : > { %v1904_v18 = vpop.f32.mrb[3].mxu0  ;;  %v1952_v19 = vpop.f32.mrb[3].mxu1 }
 0x232   : > { %v885_v20 = vadd.f32 %v1902_v13, %v2552_v10  ;;  %v949_v21 = vadd.f32 %v1950_v15, %v2552_v10  ;;  %v1905_v22 = vadd.f32 %v1904_v18, %v1903_v16  ;;  %v1953_v23 = vadd.f32 %v1952_v19, %v1951_v17 }
 0x234   : > { %v1013_v24 = vmax.f32 %v885_v20, 0.0  ;;  %v1029_v25 = vmax.f32 %v949_v21, 0.0  ;;  %v888_v26 = vadd.f32 %v1905_v22, %v2552_v10  ;;  %v952_v27 = vadd.f32 %v1953_v23, %v2552_v10 }
 0x236   : > { %v1014_v28 = vmax.f32 %v888_v26, 0.0  ;;  %v1030_v29 = vmax.f32 %v952_v27, 0.0  ;;  %v1906_v30 = vpop.f32.mrb[4].mxu0  ;;  %v1954_v31 = vpop.f32.mrb[4].mxu1  ;;  %v1048_v32 = vsel %vm1047_vm0, %v1013_v24, %v885_v20  ;;  %v1064_v33 = vsel %vm1047_vm0, %v1029_v25, %v949_v21 }
 0x237   : > { %v1907_v34 = vpop.f32.mrb[5].mxu0  ;;  %v1955_v35 = vpop.f32.mrb[5].mxu1 }
 0x238   : > { %v1049_v36 = vsel %vm1047_vm0, %v1014_v28, %v888_v26  ;;  %v1065_v37 = vsel %vm1047_vm0, %v1030_v29, %v952_v27  ;;  %v1908_v38 = vadd.f32 %v1907_v34, %v1906_v30  ;;  %v1956_v39 = vadd.f32 %v1955_v35, %v1954_v31  ;;  %v1909_v40 = vpop.f32.mrb[6].mxu0  ;;  %v1957_v41 = vpop.f32.mrb[6].mxu1 }
 0x239   : > { %v2569_v42 = vpack.c.bf16 %v1049_v36, %v1048_v32  ;;  %v2571_v43 = vpack.c.bf16 %v1065_v37, %v1064_v33  ;;  %v1910_v44 = vpop.f32.mrb[7].mxu0  ;;  %v1958_v45 = vpop.f32.mrb[7].mxu1 }
 0x23a   : > { %v893_v46 = vadd.f32 %v1908_v38, %v2552_v10  ;;  %v957_v47 = vadd.f32 %v1956_v39, %v2552_v10  ;;  %v1911_v48 = vadd.f32 %v1910_v44, %v1909_v40  ;;  %v1959_v49 = vadd.f32 %v1958_v45, %v1957_v41 }
 0x23b   : > { %1769 = vst [vmem:[%s2350_s10] sm:$0xff] %v2569_v42   ;;  %1852 = vst [vmem:[%s2350_s10 + $0x40] sm:$0xff] %v2571_v43   ;;  %2084 = vmatprep.mubr.bf16.mxu0 (!%p1715_p9), %v2569_v42  ;;  %2100 = vmatprep.mubr.bf16.mxu1 (!%p1715_p9), %v2571_v43  ;;  %v2248_v42 = vld [vmem:[%s2344_s6 + $0x20] sm:$0xff] (!%p1715_p9)   ;;  %v2249_v43 = vld [vmem:[%s2344_s6 + $0x28] sm:$0xff] (!%p1715_p9)  }
 0x23c   : > { %v1015_v50 = vmax.f32 %v893_v46, 0.0  ;;  %v1031_v51 = vmax.f32 %v957_v47, 0.0  ;;  %v896_v52 = vadd.f32 %v1911_v48, %v2552_v10  ;;  %v960_v53 = vadd.f32 %v1959_v49, %v2552_v10 }
 0x23e   : > { %v1016_v54 = vmax.f32 %v896_v52, 0.0  ;;  %v1032_v55 = vmax.f32 %v960_v53, 0.0  ;;  %v1912_v56 = vpop.f32.mrb[8].mxu0  ;;  %v1960_v57 = vpop.f32.mrb[8].mxu1  ;;  %v1050_v58 = vsel %vm1047_vm0, %v1015_v50, %v893_v46  ;;  %v1066_v59 = vsel %vm1047_vm0, %v1031_v51, %v957_v47 }
 0x23f   : > { %v1913_v60 = vpop.f32.mrb[9].mxu0  ;;  %v1961_v61 = vpop.f32.mrb[9].mxu1 }
 0x240   : > { %v1051_v62 = vsel %vm1047_vm0, %v1016_v54, %v896_v52  ;;  %v1067_v63 = vsel %vm1047_vm0, %v1032_v55, %v960_v53  ;;  %v1914_v0 = vadd.f32 %v1913_v60, %v1912_v56  ;;  %v1962_v1 = vadd.f32 %v1961_v61, %v1960_v57  ;;  %v1915_v2 = vpop.f32.mrb[10].mxu0  ;;  %v1963_v3 = vpop.f32.mrb[10].mxu1 }
 0x241   : > { %v2589_v4 = vpack.c.bf16 %v1051_v62, %v1050_v58  ;;  %v2591_v5 = vpack.c.bf16 %v1067_v63, %v1066_v59  ;;  %v1916_v6 = vpop.f32.mrb[11].mxu0  ;;  %v1964_v7 = vpop.f32.mrb[11].mxu1 }
 0x242   : > { %v901_v8 = vadd.f32 %v1914_v0, %v2552_v10  ;;  %v965_v9 = vadd.f32 %v1962_v1, %v2552_v10  ;;  %v1917_v11 = vadd.f32 %v1916_v6, %v1915_v2  ;;  %v1965_v12 = vadd.f32 %v1964_v7, %v1963_v3 }
 0x243   : > { %1845 = vst [vmem:[%s2350_s10 + $0x8] sm:$0xff] %v2589_v4   ;;  %1853 = vst [vmem:[%s2350_s10 + $0x48] sm:$0xff] %v2591_v5  }
 0x244   : > { %v1017_v13 = vmax.f32 %v901_v8, 0.0  ;;  %v1033_v15 = vmax.f32 %v965_v9, 0.0  ;;  %v904_v16 = vadd.f32 %v1917_v11, %v2552_v10  ;;  %v968_v17 = vadd.f32 %v1965_v12, %v2552_v10 }
 0x246   : > { %v1018_v18 = vmax.f32 %v904_v16, 0.0  ;;  %v1034_v19 = vmax.f32 %v968_v17, 0.0  ;;  %v1918_v20 = vpop.f32.mrb[12].mxu0  ;;  %v1966_v21 = vpop.f32.mrb[12].mxu1  ;;  %v1052_v22 = vsel %vm1047_vm0, %v1017_v13, %v901_v8  ;;  %v1068_v23 = vsel %vm1047_vm0, %v1033_v15, %v965_v9 }
 0x247   : > { %v1919_v24 = vpop.f32.mrb[13].mxu0  ;;  %v1967_v25 = vpop.f32.mrb[13].mxu1 }
 0x248   : > { %v1053_v26 = vsel %vm1047_vm0, %v1018_v18, %v904_v16  ;;  %v1069_v27 = vsel %vm1047_vm0, %v1034_v19, %v968_v17  ;;  %v1920_v28 = vadd.f32 %v1919_v24, %v1918_v20  ;;  %v1968_v29 = vadd.f32 %v1967_v25, %v1966_v21  ;;  %v1921_v30 = vpop.f32.mrb[14].mxu0  ;;  %v1969_v31 = vpop.f32.mrb[14].mxu1 }
 0x249   : > { %v2609_v32 = vpack.c.bf16 %v1053_v26, %v1052_v22  ;;  %v2611_v33 = vpack.c.bf16 %v1069_v27, %v1068_v23  ;;  %v1922_v34 = vpop.f32.mrb[15].mxu0  ;;  %v1970_v35 = vpop.f32.mrb[15].mxu1 }
 0x24a   : > { %v909_v36 = vadd.f32 %v1920_v28, %v2552_v10  ;;  %v973_v37 = vadd.f32 %v1968_v29, %v2552_v10  ;;  %v1923_v38 = vadd.f32 %v1922_v34, %v1921_v30  ;;  %v1971_v39 = vadd.f32 %v1970_v35, %v1969_v31 }
 0x24b   : > { %1846 = vst [vmem:[%s2350_s10 + $0x10] sm:$0xff] %v2609_v32   ;;  %1854 = vst [vmem:[%s2350_s10 + $0x50] sm:$0xff] %v2611_v33  }
 0x24c   : > { %v1019_v40 = vmax.f32 %v909_v36, 0.0  ;;  %v1035_v41 = vmax.f32 %v973_v37, 0.0  ;;  %v912_v44 = vadd.f32 %v1923_v38, %v2552_v10  ;;  %v976_v45 = vadd.f32 %v1971_v39, %v2552_v10 }
 0x24e   : > { %v1020_v46 = vmax.f32 %v912_v44, 0.0  ;;  %v1036_v47 = vmax.f32 %v976_v45, 0.0  ;;  %v1924_v48 = vpop.f32.mrb[16].mxu0  ;;  %v1972_v49 = vpop.f32.mrb[16].mxu1  ;;  %v1054_v50 = vsel %vm1047_vm0, %v1019_v40, %v909_v36  ;;  %v1070_v51 = vsel %vm1047_vm0, %v1035_v41, %v973_v37 }
 0x24f   : > { %v1925_v52 = vpop.f32.mrb[17].mxu0  ;;  %v1973_v53 = vpop.f32.mrb[17].mxu1 }
 0x250   : > { %v1055_v54 = vsel %vm1047_vm0, %v1020_v46, %v912_v44  ;;  %v1071_v55 = vsel %vm1047_vm0, %v1036_v47, %v976_v45  ;;  %v1926_v56 = vadd.f32 %v1925_v52, %v1924_v48  ;;  %v1974_v57 = vadd.f32 %v1973_v53, %v1972_v49  ;;  %v1927_v58 = vpop.f32.mrb[18].mxu0  ;;  %v1975_v59 = vpop.f32.mrb[18].mxu1 }
 0x251   : > { %v2629_v60 = vpack.c.bf16 %v1055_v54, %v1054_v50  ;;  %v2631_v61 = vpack.c.bf16 %v1071_v55, %v1070_v51  ;;  %v1928_v62 = vpop.f32.mrb[19].mxu0  ;;  %v1976_v63 = vpop.f32.mrb[19].mxu1 }
 0x252   : > { %v917_v0 = vadd.f32 %v1926_v56, %v2552_v10  ;;  %v981_v1 = vadd.f32 %v1974_v57, %v2552_v10  ;;  %v1929_v2 = vadd.f32 %v1928_v62, %v1927_v58  ;;  %v1977_v3 = vadd.f32 %v1976_v63, %v1975_v59 }
 0x253   : > { %1847 = vst [vmem:[%s2350_s10 + $0x18] sm:$0xff] %v2629_v60   ;;  %1855 = vst [vmem:[%s2350_s10 + $0x58] sm:$0xff] %v2631_v61  }
 0x254   : > { %v1021_v6 = vmax.f32 %v917_v0, 0.0  ;;  %v1037_v7 = vmax.f32 %v981_v1, 0.0  ;;  %v920_v8 = vadd.f32 %v1929_v2, %v2552_v10  ;;  %v984_v9 = vadd.f32 %v1977_v3, %v2552_v10 }
 0x256   : > { %v1022_v11 = vmax.f32 %v920_v8, 0.0  ;;  %v1038_v12 = vmax.f32 %v984_v9, 0.0  ;;  %v1930_v13 = vpop.f32.mrb[20].mxu0  ;;  %v1978_v15 = vpop.f32.mrb[20].mxu1  ;;  %v1056_v16 = vsel %vm1047_vm0, %v1021_v6, %v917_v0  ;;  %v1072_v17 = vsel %vm1047_vm0, %v1037_v7, %v981_v1 }
 0x257   : > { %v1931_v18 = vpop.f32.mrb[21].mxu0  ;;  %v1979_v19 = vpop.f32.mrb[21].mxu1 }
 0x258   : > { %v1057_v20 = vsel %vm1047_vm0, %v1022_v11, %v920_v8  ;;  %v1073_v21 = vsel %vm1047_vm0, %v1038_v12, %v984_v9  ;;  %v1932_v22 = vadd.f32 %v1931_v18, %v1930_v13  ;;  %v1980_v23 = vadd.f32 %v1979_v19, %v1978_v15  ;;  %v1933_v24 = vpop.f32.mrb[22].mxu0  ;;  %v1981_v25 = vpop.f32.mrb[22].mxu1 }
 0x259   : > { %v2649_v26 = vpack.c.bf16 %v1057_v20, %v1056_v16  ;;  %v2651_v27 = vpack.c.bf16 %v1073_v21, %v1072_v17  ;;  %v1934_v28 = vpop.f32.mrb[23].mxu0  ;;  %v1982_v29 = vpop.f32.mrb[23].mxu1 }
 0x25a   : > { %v925_v30 = vadd.f32 %v1932_v22, %v2552_v10  ;;  %v989_v31 = vadd.f32 %v1980_v23, %v2552_v10  ;;  %v1935_v34 = vadd.f32 %v1934_v28, %v1933_v24  ;;  %v1983_v35 = vadd.f32 %v1982_v29, %v1981_v25 }
 0x25b   : > { %1848 = vst [vmem:[%s2350_s10 + $0x20] sm:$0xff] %v2649_v26   ;;  %1856 = vst [vmem:[%s2350_s10 + $0x60] sm:$0xff] %v2651_v27  }
 0x25c   : > { %v1023_v36 = vmax.f32 %v925_v30, 0.0  ;;  %v1039_v37 = vmax.f32 %v989_v31, 0.0  ;;  %v928_v38 = vadd.f32 %v1935_v34, %v2552_v10  ;;  %v992_v39 = vadd.f32 %v1983_v35, %v2552_v10 }
 0x25e   : > { %v1024_v40 = vmax.f32 %v928_v38, 0.0  ;;  %v1040_v41 = vmax.f32 %v992_v39, 0.0  ;;  %v1936_v44 = vpop.f32.mrb[24].mxu0  ;;  %v1984_v45 = vpop.f32.mrb[24].mxu1  ;;  %v1058_v46 = vsel %vm1047_vm0, %v1023_v36, %v925_v30  ;;  %v1074_v47 = vsel %vm1047_vm0, %v1039_v37, %v989_v31 }
 0x25f   : > { %v1937_v48 = vpop.f32.mrb[25].mxu0  ;;  %v1985_v49 = vpop.f32.mrb[25].mxu1 }
 0x260   : > { %v1059_v50 = vsel %vm1047_vm0, %v1024_v40, %v928_v38  ;;  %v1075_v51 = vsel %vm1047_vm0, %v1040_v41, %v992_v39  ;;  %v1938_v52 = vadd.f32 %v1937_v48, %v1936_v44  ;;  %v1986_v53 = vadd.f32 %v1985_v49, %v1984_v45  ;;  %v1939_v54 = vpop.f32.mrb[26].mxu0  ;;  %v1987_v55 = vpop.f32.mrb[26].mxu1 }
 0x261   : > { %v2669_v56 = vpack.c.bf16 %v1059_v50, %v1058_v46  ;;  %v2671_v57 = vpack.c.bf16 %v1075_v51, %v1074_v47  ;;  %v1940_v58 = vpop.f32.mrb[27].mxu0  ;;  %v1988_v59 = vpop.f32.mrb[27].mxu1  ;;  %v2245_v50 = vld [vmem:[%s2344_s6 + $0x8] sm:$0xff] (!%p1715_p9)   ;;  %v2247_v51 = vld [vmem:[%s2344_s6 + $0x18] sm:$0xff] (!%p1715_p9)  }
 0x262   : > { %v933_v62 = vadd.f32 %v1938_v52, %v2552_v10  ;;  %v997_v63 = vadd.f32 %v1986_v53, %v2552_v10  ;;  %v1941_v0 = vadd.f32 %v1940_v58, %v1939_v54  ;;  %v1989_v1 = vadd.f32 %v1988_v59, %v1987_v55  ;;  %v2250_v52 = vld [vmem:[%s2344_s6 + $0x30] sm:$0xff] (!%p1715_p9)   ;;  %v2251_v53 = vld [vmem:[%s2344_s6 + $0x38] sm:$0xff] (!%p1715_p9)  }
 0x263   : > { %1849 = vst [vmem:[%s2350_s10 + $0x28] sm:$0xff] %v2669_v56   ;;  %1857 = vst [vmem:[%s2350_s10 + $0x68] sm:$0xff] %v2671_v57  }
 0x264   : > { %v1025_v2 = vmax.f32 %v933_v62, 0.0  ;;  %v1041_v3 = vmax.f32 %v997_v63, 0.0  ;;  %v936_v6 = vadd.f32 %v1941_v0, %v2552_v10  ;;  %v1000_v7 = vadd.f32 %v1989_v1, %v2552_v10 }
 0x266   : > { %v1026_v8 = vmax.f32 %v936_v6, 0.0  ;;  %v1042_v9 = vmax.f32 %v1000_v7, 0.0  ;;  %v1942_v11 = vpop.f32.mrb[28].mxu0  ;;  %v1990_v12 = vpop.f32.mrb[28].mxu1  ;;  %v1060_v13 = vsel %vm1047_vm0, %v1025_v2, %v933_v62  ;;  %v1076_v15 = vsel %vm1047_vm0, %v1041_v3, %v997_v63 }
 0x267   : > { %v1943_v16 = vpop.f32.mrb[29].mxu0  ;;  %v1991_v17 = vpop.f32.mrb[29].mxu1 }
 0x268   : > { %v1061_v18 = vsel %vm1047_vm0, %v1026_v8, %v936_v6  ;;  %v1077_v19 = vsel %vm1047_vm0, %v1042_v9, %v1000_v7  ;;  %v1944_v20 = vadd.f32 %v1943_v16, %v1942_v11  ;;  %v1992_v21 = vadd.f32 %v1991_v17, %v1990_v12  ;;  %v1945_v22 = vpop.f32.mrb[30].mxu0  ;;  %v1993_v23 = vpop.f32.mrb[30].mxu1 }
 0x269   : > { %v2689_v24 = vpack.c.bf16 %v1061_v18, %v1060_v13  ;;  %v2691_v25 = vpack.c.bf16 %v1077_v19, %v1076_v15  ;;  %v1946_v28 = vpop.f32.mrb[31].mxu0  ;;  %v1994_v29 = vpop.f32.mrb[31].mxu1 }
 0x26a   : > { %v941_v30 = vadd.f32 %v1944_v20, %v2552_v10  ;;  %v1005_v31 = vadd.f32 %v1992_v21, %v2552_v10  ;;  %v1947_v34 = vadd.f32 %v1946_v28, %v1945_v22  ;;  %v1995_v35 = vadd.f32 %v1994_v29, %v1993_v23 }
 0x26b   : > { %1850 = vst [vmem:[%s2350_s10 + $0x30] sm:$0xff] %v2689_v24   ;;  %1858 = vst [vmem:[%s2350_s10 + $0x70] sm:$0xff] %v2691_v25  }
 0x26c   : > { %v1027_v36 = vmax.f32 %v941_v30, 0.0  ;;  %v1043_v37 = vmax.f32 %v1005_v31, 0.0  ;;  %v944_v38 = vadd.f32 %v1947_v34, %v2552_v10  ;;  %v1008_v39 = vadd.f32 %v1995_v35, %v2552_v10  ;;  %v2244_v10 = vld [vmem:[%s2344_s6] sm:$0xff] (!%p1715_p9)  }
 0x26d   : > { %1242 = sbr.rel (%p1715_p9) target bundleno = 895 (0x37f), region = 79  ;;  %2068 = vmatprep.subr.bf16.mxu0 (!%p1715_p9), %v2244_v10  ;;  %2148 = vmatprep.subr.bf16.mxu1 (!%p1715_p9), %v2244_v10 }
 0x26e   : > { %v1028_v40 = vmax.f32 %v944_v38, 0.0  ;;  %v1044_v41 = vmax.f32 %v1008_v39, 0.0  ;;  %v1062_v44 = vsel %vm1047_vm0, %v1027_v36, %v941_v30  ;;  %v1078_v45 = vsel %vm1047_vm0, %v1043_v37, %v1005_v31  ;;  %2069 = vmatpush3.bf16.msra.mxu0 (!%p1715_p9), %v2244_v10  ;;  %2156 = vmatpush3.bf16.msra.mxu1 (!%p1715_p9), %v2244_v10 }
 0x26f   : > { %2070 = vmatprep.subr.bf16.mxu0 (!%p1715_p9), %v2245_v50  ;;  %2149 = vmatprep.subr.bf16.mxu1 (!%p1715_p9), %v2245_v50 }
 0x270   : > { %v1063_v46 = vsel %vm1047_vm0, %v1028_v40, %v944_v38  ;;  %v1079_v47 = vsel %vm1047_vm0, %v1044_v41, %v1008_v39 }
 0x271   : > { %v1087_v48 = vpack.c.bf16 %v1063_v46, %v1062_v44  ;;  %v1095_v49 = vpack.c.bf16 %v1079_v47, %v1078_v45 }
 0x272   : > { %2071 = vmatpush3.bf16.msra.mxu0 (!%p1715_p9), %v2245_v50  ;;  %2157 = vmatpush3.bf16.msra.mxu1 (!%p1715_p9), %v2245_v50 }
 0x273   : > { %1851 = vst [vmem:[%s2350_s10 + $0x38] sm:$0xff] %v1087_v48   ;;  %1859 = vst [vmem:[%s2350_s10 + $0x78] sm:$0xff] %v1095_v49   ;;  %2072 = vmatprep.subr.bf16.mxu0 (!%p1715_p9), %v2246_v14  ;;  %2150 = vmatprep.subr.bf16.mxu1 (!%p1715_p9), %v2246_v14 }
 0x276   : > { %2073 = vmatpush3.bf16.msra.mxu0 %v2246_v14  ;;  %2158 = vmatpush3.bf16.msra.mxu1 %v2246_v14 }
 0x277   : > { %2074 = vmatprep.subr.bf16.mxu0 %v2247_v51  ;;  %2151 = vmatprep.subr.bf16.mxu1 %v2247_v51 }
 0x27a   : > { %2075 = vmatpush3.bf16.msra.mxu0 %v2247_v51  ;;  %2159 = vmatpush3.bf16.msra.mxu1 %v2247_v51 }
 0x27b   : > { %2076 = vmatprep.subr.bf16.mxu0 %v2248_v42  ;;  %2152 = vmatprep.subr.bf16.mxu1 %v2248_v42 }
 0x27e   : > { %2077 = vmatpush3.bf16.msra.mxu0 %v2248_v42  ;;  %2160 = vmatpush3.bf16.msra.mxu1 %v2248_v42 }
 0x27f   : > { %2078 = vmatprep.subr.bf16.mxu0 %v2249_v43  ;;  %2153 = vmatprep.subr.bf16.mxu1 %v2249_v43 }
 0x282   : > { %2079 = vmatpush3.bf16.msra.mxu0 %v2249_v43  ;;  %2161 = vmatpush3.bf16.msra.mxu1 %v2249_v43 }
 0x283   : > { %2080 = vmatprep.subr.bf16.mxu0 %v2250_v52  ;;  %2154 = vmatprep.subr.bf16.mxu1 %v2250_v52 }
 0x286   : > { %2081 = vmatpush3.bf16.msra.mxu0 %v2250_v52  ;;  %2162 = vmatpush3.bf16.msra.mxu1 %v2250_v52 }
 0x287   : > { %2082 = vmatprep.subr.bf16.mxu0 %v2251_v53  ;;  %2155 = vmatprep.subr.bf16.mxu1 %v2251_v53 }
 0x28a   : > { %2083 = vmatpush3.bf16.msra.mxu0 %v2251_v53  ;;  %2163 = vmatpush3.bf16.msra.mxu1 %v2251_v53 }
 0x28d   : > { %2085 = vmatmul.mubr.bf16.vlgmr.msra.gmra.mrb[0].mxu0 %v2589_v4  ;;  %2101 = vmatmul.mubr.bf16.vlgmr.msra.gmra.mrb[0].mxu1 %v2591_v5 }
 0x28e   : > { %2088 = vmatprep.mubr.bf16.mxu0 %v2609_v32  ;;  %2104 = vmatprep.mubr.bf16.mxu1 %v2611_v33 }
 0x295   : > { %2089 = vmatmul.mubr.bf16.gmra.mrb[4].mxu0 %v2629_v60  ;;  %2105 = vmatmul.mubr.bf16.gmra.mrb[4].mxu1 %v2631_v61 }
 0x296   : > { %2092 = vmatprep.mubr.bf16.mxu0 %v2649_v26  ;;  %2108 = vmatprep.mubr.bf16.mxu1 %v2651_v27 }
 0x29d   : > { %2093 = vmatmul.mubr.bf16.gmra.mrb[8].mxu0 %v2669_v56  ;;  %2109 = vmatmul.mubr.bf16.gmra.mrb[8].mxu1 %v2671_v57 }
 0x29e   : > { %2096 = vmatprep.mubr.bf16.mxu0 %v2689_v24  ;;  %2112 = vmatprep.mubr.bf16.mxu1 %v2691_v25 }
 0x2a5   : > { %2097 = vmatmul.mubr.bf16.gmra.mrb[12].mxu0 %v1087_v48  ;;  %2113 = vmatmul.mubr.bf16.gmra.mrb[12].mxu1 %v1095_v49 }
 0x360   : > { %v2086_v4 = vpop.f32.mrb[0].mxu0  ;;  %v2102_v5 = vpop.f32.mrb[0].mxu1 }
 0x361   : > { %v1342_v32 = vpop.f32.mrb[1].mxu0  ;;  %v1406_v33 = vpop.f32.mrb[1].mxu1 }
 0x362   : > { %v2087_v60 = vpop.f32.mrb[2].mxu0  ;;  %v2103_v61 = vpop.f32.mrb[2].mxu1 }
 0x363   : > { %v1470_v26 = vpack.c.bf16 %v2087_v60, %v2086_v4  ;;  %v1478_v27 = vpack.c.bf16 %v2103_v61, %v2102_v5  ;;  %v1345_v54 = vpop.f32.mrb[3].mxu0  ;;  %v1409_v55 = vpop.f32.mrb[3].mxu1 }
 0x364   : > { %v1469_v56 = vpack.c.bf16 %v1345_v54, %v1342_v32  ;;  %v1477_v57 = vpack.c.bf16 %v1409_v55, %v1406_v33 }
 0x365   : > { %1492 = vst [vmem:[%s2737_s23 + $0x8] sm:$0xff] %v1470_v26  ;;  %1500 = vst [vmem:[%s2737_s23 + $0x48] sm:$0xff] %v1478_v27 }
 0x366   : > { %1491 = vst [vmem:[%s2737_s23] sm:$0xff] %v1469_v56  ;;  %1499 = vst [vmem:[%s2737_s23 + $0x40] sm:$0xff] %v1477_v57 }
 0x368   : > { %v2090_v58 = vpop.f32.mrb[4].mxu0  ;;  %v2106_v59 = vpop.f32.mrb[4].mxu1 }
 0x369   : > { %v1358_v62 = vpop.f32.mrb[5].mxu0  ;;  %v1422_v63 = vpop.f32.mrb[5].mxu1 }
 0x36a   : > { %v2091_v0 = vpop.f32.mrb[6].mxu0  ;;  %v2107_v1 = vpop.f32.mrb[6].mxu1 }
 0x36b   : > { %v1472_v2 = vpack.c.bf16 %v2091_v0, %v2090_v58  ;;  %v1480_v3 = vpack.c.bf16 %v2107_v1, %v2106_v59  ;;  %v1361_v6 = vpop.f32.mrb[7].mxu0  ;;  %v1425_v7 = vpop.f32.mrb[7].mxu1 }
 0x36c   : > { %v1471_v8 = vpack.c.bf16 %v1361_v6, %v1358_v62  ;;  %v1479_v9 = vpack.c.bf16 %v1425_v7, %v1422_v63 }
 0x36d   : > { %1494 = vst [vmem:[%s2737_s23 + $0x18] sm:$0xff] %v1472_v2  ;;  %1502 = vst [vmem:[%s2737_s23 + $0x58] sm:$0xff] %v1480_v3 }
 0x36e   : > { %1493 = vst [vmem:[%s2737_s23 + $0x10] sm:$0xff] %v1471_v8  ;;  %1501 = vst [vmem:[%s2737_s23 + $0x50] sm:$0xff] %v1479_v9 }
 0x370   : > { %v2094_v11 = vpop.f32.mrb[8].mxu0  ;;  %v2110_v12 = vpop.f32.mrb[8].mxu1 }
 0x371   : > { %v1374_v13 = vpop.f32.mrb[9].mxu0  ;;  %v1438_v15 = vpop.f32.mrb[9].mxu1 }
 0x372   : > { %v2095_v16 = vpop.f32.mrb[10].mxu0  ;;  %v2111_v17 = vpop.f32.mrb[10].mxu1 }
 0x373   : > { %v1474_v18 = vpack.c.bf16 %v2095_v16, %v2094_v11  ;;  %v1482_v19 = vpack.c.bf16 %v2111_v17, %v2110_v12  ;;  %v1377_v20 = vpop.f32.mrb[11].mxu0  ;;  %v1441_v21 = vpop.f32.mrb[11].mxu1 }
 0x374   : > { %v1473_v22 = vpack.c.bf16 %v1377_v20, %v1374_v13  ;;  %v1481_v23 = vpack.c.bf16 %v1441_v21, %v1438_v15 }
 0x375   : > { %1496 = vst [vmem:[%s2737_s23 + $0x28] sm:$0xff] %v1474_v18  ;;  %1504 = vst [vmem:[%s2737_s23 + $0x68] sm:$0xff] %v1482_v19 }
 0x376   : > { %1495 = vst [vmem:[%s2737_s23 + $0x20] sm:$0xff] %v1473_v22  ;;  %1503 = vst [vmem:[%s2737_s23 + $0x60] sm:$0xff] %v1481_v23 }
 0x378   : > { %v2098_v24 = vpop.f32.mrb[12].mxu0  ;;  %v2114_v25 = vpop.f32.mrb[12].mxu1 }
 0x379   : > { %v1390_v28 = vpop.f32.mrb[13].mxu0  ;;  %v1454_v29 = vpop.f32.mrb[13].mxu1 }
 0x37a   : > { %v2099_v30 = vpop.f32.mrb[14].mxu0  ;;  %v2115_v31 = vpop.f32.mrb[14].mxu1 }
 0x37b   : > { %v1476_v34 = vpack.c.bf16 %v2099_v30, %v2098_v24  ;;  %v1484_v35 = vpack.c.bf16 %v2115_v31, %v2114_v25  ;;  %v1393_v36 = vpop.f32.mrb[15].mxu0  ;;  %v1457_v37 = vpop.f32.mrb[15].mxu1 }
 0x37c   : > { %v1475_v38 = vpack.c.bf16 %v1393_v36, %v1390_v28  ;;  %v1483_v39 = vpack.c.bf16 %v1457_v37, %v1454_v29 }
 0x37d   : > { %1498 = vst [vmem:[%s2737_s23 + $0x38] sm:$0xff] %v1476_v34  ;;  %1506 = vst [vmem:[%s2737_s23 + $0x78] sm:$0xff] %v1484_v35 }
 0x37e   : > { %1497 = vst [vmem:[%s2737_s23 + $0x30] sm:$0xff] %v1475_v38  ;;  %1505 = vst [vmem:[%s2737_s23 + $0x70] sm:$0xff] %v1483_v39 }
 0x37f PF: > { %s15_s20 = sadd.s32 1, %s2276_s20   ;;  %s2770_s18 = smov %s2272_s19 }
 0x380   : > { %p12_p10 = scmp.ge.s32.totalorder %s15_s20, 4   ;;  %s2771_s19 = smov %s2773_s21 }
 0x382   :  { %14 = sbr.rel (!%p12_p10) target bundleno = 2 (0x2), region = 127 }

</bundles_post_ra>
